<compile_context>
chip_gen: v6e
topology: v6e:2x2x1
jax: 0.10.0
libtpu: 0.0.40
codegen_flags: <defaults>
</compile_context>

<pallas_src>
import functools

import jax
import jax.numpy as jnp
from jax import lax
from jax.experimental import pallas as pl
from jax.experimental.pallas import tpu as pltpu


def _vmem_limit_bytes():
    # per-chip scoped-VMEM budget: half of physical (64 MiB v7x -> 32 MiB,
    # 128 MiB v5e/v6e -> 64 MiB), capped at 96 MiB, floored at 32 MiB.
    try:
        cap = int(pltpu.get_tpu_info().vmem_capacity_bytes)
    except Exception:
        cap = 64 * 1024 * 1024
    return int(min(96 * 1024 * 1024, max(32 * 1024 * 1024, cap // 2)))


VMEM_LIMIT = _vmem_limit_bytes()

# Tile targets.  tm/tk are MXU-friendly; tn=1024 keeps the activation panel from being
# re-streamed many times across N blocks on the wide (3H / FFN) matmuls.
_TM, _TN, _TK = 256, 1024, 512


def _fit_tile(dim, target):
    """Largest tile <= target that divides `dim` and is 128- (or 8-) aligned; if no such
    divisor exists, fall back to the full dim (full-dim blocks are always legal)."""
    if dim <= target:
        return dim
    for align in (128, 8):
        t = (target // align) * align
        while t >= align:
            if dim % t == 0:
                return t
            t -= align
    return dim


def _batch_tile(b, target=8):
    if b <= target:
        return b
    for cand in (64, 32, 16, 8):
        if b % cand == 0 and cand <= max(target, 8):
            return cand
    return b


# ----------------------------------------------------------------------------- kernels

def _dense_kernel(x_ref, w_ref, b_ref, o_ref, acc_ref, *, activation):
    @pl.when(pl.program_id(2) == 0)
    def _():
        acc_ref[...] = jnp.zeros_like(acc_ref)

    # bf16 x bf16 -> f32 accumulate on the MXU.
    acc_ref[...] += jnp.dot(x_ref[...], w_ref[...], preferred_element_type=jnp.float32)

    @pl.when(pl.program_id(2) == pl.num_programs(2) - 1)
    def _():
        y = acc_ref[...] + b_ref[...]                       # f32 epilogue
        if activation == "gelu":
            # tanh-approx GELU; tanh goes to the EUP slot.
            y = 0.5 * y * (1.0 + jnp.tanh(0.7978845608028654 * (y + 0.044715 * y * y * y)))
        o_ref[...] = y.astype(o_ref.dtype)


def dense(x, w, b, activation=None, out_dtype=jnp.bfloat16):
    """y = act(x @ w + b), tiled (M//tm, N//tn, K//tk) with f32 VMEM accumulator.
    Inputs/outputs are bf16 (activations stay bf16 between kernels)."""
    m, k = x.shape
    n = w.shape[1]
    tm, tn, tk = _fit_tile(m, _TM), _fit_tile(n, _TN), _fit_tile(k, _TK)
    if x.dtype != jnp.bfloat16:
        x = x.astype(jnp.bfloat16)
    if w.dtype != jnp.bfloat16:
        w = w.astype(jnp.bfloat16)
    kernel = functools.partial(_dense_kernel, activation=activation)
    # TODO(synk): on v7x, halve tm/tn when M//tm==1 and N//tn==1 so both TensorCores get work.
    return pl.pallas_call(
        kernel,
        out_shape=jax.ShapeDtypeStruct((m, n), out_dtype),
        grid_spec=pltpu.PrefetchScalarGridSpec(
            num_scalar_prefetch=0,
            grid=(m // tm, n // tn, k // tk),
            in_specs=[pl.BlockSpec((tm, tk), lambda i, j, kk: (i, kk)),
                      pl.BlockSpec((tk, tn), lambda i, j, kk: (kk, j)),
                      pl.BlockSpec((1, tn), lambda i, j, kk: (0, j))],
            out_specs=pl.BlockSpec((tm, tn), lambda i, j, kk: (i, j)),
            scratch_shapes=[pltpu.VMEM((tm, tn), jnp.float32)]),
        compiler_params=pltpu.CompilerParams(
            dimension_semantics=("parallel", "parallel", "arbitrary"),
            vmem_limit_bytes=VMEM_LIMIT),
    )(x, w, b)


def _dense_qkv_kernel(x_ref, w_ref, b_ref, o_ref, acc_ref):
    @pl.when(pl.program_id(2) == 0)
    def _():
        acc_ref[...] = jnp.zeros_like(acc_ref)

    acc_ref[...] += jnp.dot(x_ref[...], w_ref[0], preferred_element_type=jnp.float32)

    @pl.when(pl.program_id(2) == pl.num_programs(2) - 1)
    def _():
        o_ref[0] = (acc_ref[...] + b_ref[0]).astype(o_ref.dtype)


def dense_qkv(x, w3, b3):
    """Fused QKV projection.  w3: (3, H, H), b3: (3, 1, H) -> output (3, M, H) bf16.
    The (3, M, H) layout lets the attention kernel index q/k/v blocks directly (no
    XLA head-split transposes), and keeps every block's lane dim == H (full)."""
    m, k = x.shape
    h = w3.shape[2]
    tm, tk = _fit_tile(m, _TM), _fit_tile(k, _TK)
    tn = _fit_tile(h, _TN)                      # tn always divides H
    ncol = h // tn
    if x.dtype != jnp.bfloat16:
        x = x.astype(jnp.bfloat16)
    return pl.pallas_call(
        _dense_qkv_kernel,
        out_shape=jax.ShapeDtypeStruct((3, m, h), jnp.bfloat16),
        grid_spec=pltpu.PrefetchScalarGridSpec(
            num_scalar_prefetch=0,
            grid=(m // tm, 3 * ncol, k // tk),
            in_specs=[pl.BlockSpec((tm, tk), lambda i, j, kk: (i, kk)),
                      pl.BlockSpec((1, tk, tn), lambda i, j, kk: (j // ncol, kk, j % ncol)),
                      pl.BlockSpec((1, 1, tn), lambda i, j, kk: (j // ncol, 0, j % ncol))],
            out_specs=pl.BlockSpec((1, tm, tn), lambda i, j, kk: (j // ncol, i, j % ncol)),
            scratch_shapes=[pltpu.VMEM((tm, tn), jnp.float32)]),
        compiler_params=pltpu.CompilerParams(
            dimension_semantics=("parallel", "parallel", "arbitrary"),
            vmem_limit_bytes=VMEM_LIMIT),
    )(x, w3, b3)


def _dense_add_ln_kernel(x_ref, w_ref, b_ref, res_ref, g_ref, bb_ref, o_ref, acc_ref, *, eps):
    @pl.when(pl.program_id(1) == 0)
    def _():
        acc_ref[...] = jnp.zeros_like(acc_ref)

    acc_ref[...] += jnp.dot(x_ref[...], w_ref[...], preferred_element_type=jnp.float32)

    @pl.when(pl.program_id(1) == pl.num_programs(1) - 1)
    def _():
        # fused epilogue: bias + residual + LayerNorm (all f32), bf16 writeback.
        y = acc_ref[...] + b_ref[...] + res_ref[...].astype(jnp.float32)
        mu = jnp.mean(y, axis=-1, keepdims=True)
        yc = y - mu
        var = jnp.mean(yc * yc, axis=-1, keepdims=True)
        inv = lax.rsqrt(var + eps)
        o_ref[...] = (yc * inv * g_ref[...] + bb_ref[...]).astype(o_ref.dtype)


def dense_add_layernorm(x, w, b, res, gamma, beta, eps=1e-12):
    """LayerNorm((x @ w + b) + res), fused into the matmul epilogue (bf16 output).
    N (=hidden) is kept un-tiled so the LN reduction sees the full row."""
    m, k = x.shape
    n = w.shape[1]
    tm, tk = _fit_tile(m, _TM), _fit_tile(k, _TK)
    if x.dtype != jnp.bfloat16:
        x = x.astype(jnp.bfloat16)
    kernel = functools.partial(_dense_add_ln_kernel, eps=eps)
    return pl.pallas_call(
        kernel,
        out_shape=jax.ShapeDtypeStruct((m, n), jnp.bfloat16),
        grid_spec=pltpu.PrefetchScalarGridSpec(
            num_scalar_prefetch=0,
            grid=(m // tm, k // tk),
            in_specs=[pl.BlockSpec((tm, tk), lambda i, kk: (i, kk)),
                      pl.BlockSpec((tk, n), lambda i, kk: (kk, 0)),
                      pl.BlockSpec((1, n), lambda i, kk: (0, 0)),
                      pl.BlockSpec((tm, n), lambda i, kk: (i, 0)),
                      pl.BlockSpec((1, n), lambda i, kk: (0, 0)),
                      pl.BlockSpec((1, n), lambda i, kk: (0, 0))],
            out_specs=pl.BlockSpec((tm, n), lambda i, kk: (i, 0)),
            scratch_shapes=[pltpu.VMEM((tm, n), jnp.float32)]),
        compiler_params=pltpu.CompilerParams(
            dimension_semantics=("parallel", "arbitrary"),
            vmem_limit_bytes=VMEM_LIMIT),
    )(x, w, b, res, gamma, beta)


def _ln_kernel(x_ref, g_ref, b_ref, o_ref, *, eps):
    x = x_ref[...].astype(jnp.float32)
    mu = jnp.mean(x, axis=-1, keepdims=True)
    xc = x - mu
    var = jnp.mean(xc * xc, axis=-1, keepdims=True)
    inv = lax.rsqrt(var + eps)
    o_ref[...] = (xc * inv * g_ref[...] + b_ref[...]).astype(o_ref.dtype)


def layernorm(x, gamma, beta, eps=1e-12):
    """Plain LayerNorm (embedding LN), f32 math, bf16 output."""
    m, h = x.shape
    tm = _fit_tile(m, 512)
    kernel = functools.partial(_ln_kernel, eps=eps)
    return pl.pallas_call(
        kernel,
        out_shape=jax.ShapeDtypeStruct((m, h), jnp.bfloat16),
        grid_spec=pltpu.PrefetchScalarGridSpec(
            num_scalar_prefetch=0,
            grid=(m // tm,),
            in_specs=[pl.BlockSpec((tm, h), lambda i: (i, 0)),
                      pl.BlockSpec((1, h), lambda i: (0, 0)),
                      pl.BlockSpec((1, h), lambda i: (0, 0))],
            out_specs=pl.BlockSpec((tm, h), lambda i: (i, 0))),
        compiler_params=pltpu.CompilerParams(
            dimension_semantics=("parallel",),
            vmem_limit_bytes=VMEM_LIMIT),
    )(x, gamma, beta)


def _attention_kernel(q_ref, k_ref, v_ref, b_ref, o_ref, *, heads, dh):
    # q_ref/k_ref/v_ref: (1, S, cw) bf16 views into the fused (3, M, H) QKV output.
    # 1/sqrt(dh) is already folded into the q columns of w_qkv.
    q_all = q_ref[0]
    k_all = k_ref[0]
    v_all = v_ref[0]
    bias = b_ref[0]                                   # (1, S) f32 additive mask
    ctxs = []
    for h_i in range(heads):                          # static loop over heads in this group
        sl = slice(h_i * dh, (h_i + 1) * dh)
        q = q_all[:, sl]
        k = k_all[:, sl]
        v = v_all[:, sl]
        # scores = q @ k^T in f32 (MXU handles the transpose via dot_general dims).
        s = lax.dot_general(q, k, (((1,), (1,)), ((), ())),
                            preferred_element_type=jnp.float32) + bias
        s = s - jnp.max(s, axis=-1, keepdims=True)
        p = jnp.exp(s)
        denom = jnp.sum(p, axis=-1, keepdims=True)
        ctx = jnp.dot(p.astype(v.dtype), v, preferred_element_type=jnp.float32)
        ctxs.append((ctx * pl.reciprocal(denom, approx=True)).astype(o_ref.dtype))
    o_ref[...] = ctxs[0] if heads == 1 else jnp.concatenate(ctxs, axis=-1)


def attention(qkv3, bias, *, n_heads, head_dim, batch, seq):
    """Scaled-dot-product attention reading directly from the (3, M, H) fused QKV output
    and writing a head-merged (M, H) bf16 array (no XLA transposes).
    Grid: (batch, head_group); head groups are lane-dense (multiple of 128 wide) when
    head_dim allows it, otherwise one full-H group per batch element.
    # TODO(synk): for very long sequences, tile KV with an online softmax (flash-style)
    # instead of materializing the full (S, S) score block per head."""
    h = n_heads * head_dim
    m = batch * seq
    # pick the widest head group <= 512 lanes that is a multiple of 128; else full H.
    cw = h
    best = 0
    for hb in range(1, n_heads + 1):
        w = hb * head_dim
        if n_heads % hb == 0 and w % 128 == 0 and w <= 512 and w > best:
            best = w
    if best:
        cw = best
    n_groups = h // cw
    heads_per_blk = cw // head_dim
    kernel = functools.partial(_attention_kernel, heads=heads_per_blk, dh=head_dim)
    return pl.pallas_call(
        kernel,
        out_shape=jax.ShapeDtypeStruct((m, h), jnp.bfloat16),
        grid_spec=pltpu.PrefetchScalarGridSpec(
            num_scalar_prefetch=0,
            grid=(batch, n_groups),
            in_specs=[pl.BlockSpec((1, seq, cw), lambda bi, gi: (0, bi, gi)),
                      pl.BlockSpec((1, seq, cw), lambda bi, gi: (1, bi, gi)),
                      pl.BlockSpec((1, seq, cw), lambda bi, gi: (2, bi, gi)),
                      pl.BlockSpec((1, 1, seq), lambda bi, gi: (bi, 0, 0))],
            out_specs=pl.BlockSpec((seq, cw), lambda bi, gi: (bi, gi))),
        compiler_params=pltpu.CompilerParams(
            dimension_semantics=("parallel", "parallel"),
            vmem_limit_bytes=VMEM_LIMIT),
    )(qkv3, qkv3, qkv3, bias)


def _pool_norm_kernel(h_ref, m_ref, o_ref):
    h = h_ref[...].astype(jnp.float32)                  # (Bb, S, H)
    m = m_ref[...].astype(jnp.float32)[:, :, None]      # (Bb, S, 1)
    summed = jnp.sum(h * m, axis=1)                     # (Bb, H)
    counts = jnp.maximum(jnp.sum(m, axis=1), 1e-9)      # torch.clamp(min=1e-9)
    emb = summed / counts
    sq = jnp.sum(emb * emb, axis=1, keepdims=True)
    o_ref[...] = emb * lax.rsqrt(jnp.maximum(sq, 1e-24))   # F.normalize(p=2, dim=1)


def mean_pool_normalize(hidden, mask):
    b, s, h = hidden.shape
    bb = _batch_tile(b, 8)
    return pl.pallas_call(
        _pool_norm_kernel,
        out_shape=jax.ShapeDtypeStruct((b, h), jnp.float32),
        grid_spec=pltpu.PrefetchScalarGridSpec(
            num_scalar_prefetch=0,
            grid=(b // bb,),
            in_specs=[pl.BlockSpec((bb, s, h), lambda i: (i, 0, 0)),
                      pl.BlockSpec((bb, s), lambda i: (i, 0))],
            out_specs=pl.BlockSpec((bb, h), lambda i: (i, 0))),
        compiler_params=pltpu.CompilerParams(
            dimension_semantics=("parallel",),
            vmem_limit_bytes=VMEM_LIMIT),
    )(hidden, mask)


# ----------------------------------------------------------------------------- encoder (JAX glue around Pallas kernels)

def init_encoder_params(key, *, vocab, max_pos, type_vocab, hidden, n_heads, ffn, n_layers):
    std = 0.02
    dh = hidden // n_heads
    scale = 1.0 / (dh ** 0.5)
    ks = jax.random.split(key, 3 + n_layers)

    def nrm(k, shape):
        return jax.random.normal(k, shape, jnp.float32) * std

    params = {
        "hidden": hidden,
        "n_heads": n_heads,
        "word_emb": nrm(ks[0], (vocab, hidden)),
        "pos_emb": nrm(ks[1], (max_pos, hidden)),
        "type_emb": nrm(ks[2], (type_vocab, hidden)),
        "emb_ln_g": jnp.ones((1, hidden), jnp.float32),
        "emb_ln_b": jnp.zeros((1, hidden), jnp.float32),
        "layers": [],
    }
    for i in range(n_layers):
        lk = jax.random.split(ks[3 + i], 6)
        wq = nrm(lk[0], (hidden, hidden)) * scale     # fold 1/sqrt(dh) into the q projection
        wk = nrm(lk[1], (hidden, hidden))
        wv = nrm(lk[2], (hidden, hidden))
        layer = {
            # fused QKV projection stored as (3, H, H) bf16 so q/k/v blocks stay lane-full.
            "w_qkv": jnp.stack([wq, wk, wv], axis=0).astype(jnp.bfloat16),
            "b_qkv": jnp.zeros((3, 1, hidden), jnp.float32),
            "wo": nrm(lk[3], (hidden, hidden)).astype(jnp.bfloat16),
            "bo": jnp.zeros((1, hidden), jnp.float32),
            "ln1_g": jnp.ones((1, hidden), jnp.float32), "ln1_b": jnp.zeros((1, hidden), jnp.float32),
            "w1": nrm(lk[4], (hidden, ffn)).astype(jnp.bfloat16), "b1": jnp.zeros((1, ffn), jnp.float32),
            "w2": nrm(lk[5], (ffn, hidden)).astype(jnp.bfloat16), "b2": jnp.zeros((1, hidden), jnp.float32),
            "ln2_g": jnp.ones((1, hidden), jnp.float32), "ln2_b": jnp.zeros((1, hidden), jnp.float32),
        }
        params["layers"].append(layer)
    return params


def sentence_encode(params, ids, mask, token_type_ids):
    """SentenceEncoder.forward: transformer -> masked mean pooling -> L2 normalize."""
    b, s = ids.shape
    h = params["hidden"]
    n_heads = params["n_heads"]
    dh = h // n_heads
    maskf = mask.astype(jnp.float32)

    # Embedding gathers stay in plain JAX (glue); everything else is Pallas.
    x = (params["word_emb"][ids]
         + params["pos_emb"][:s][None, :, :]
         + params["type_emb"][token_type_ids])
    x2 = layernorm(x.reshape(b * s, h), params["emb_ln_g"], params["emb_ln_b"])   # bf16 (M, H)

    # additive attention mask bias, computed once per encode (not per layer).
    bias = ((1.0 - maskf) * (-1e9))[:, None, :]       # (B, 1, S) f32

    for layer in params["layers"]:
        # fused QKV projection -> (3, M, H) bf16; attention reads it directly and
        # writes the head-merged (M, H) context (zero layout transposes).
        qkv3 = dense_qkv(x2, layer["w_qkv"], layer["b_qkv"])
        a2 = attention(qkv3, bias, n_heads=n_heads, head_dim=dh, batch=b, seq=s)

        # output projection with fused residual + LayerNorm epilogue (bf16 out).
        x2 = dense_add_layernorm(a2, layer["wo"], layer["bo"], x2,
                                 layer["ln1_g"], layer["ln1_b"])
        # FFN: GELU matmul (bf16 intermediate), then fused residual + LayerNorm.
        f1 = dense(x2, layer["w1"], layer["b1"], activation="gelu")
        x2 = dense_add_layernorm(f1, layer["w2"], layer["b2"], x2,
                                 layer["ln2_g"], layer["ln2_b"])

    return mean_pool_normalize(x2.reshape(b, s, h), maskf)


# ----------------------------------------------------------------------------- pair_sbert forward

def pair_sbert_forward(query_params, key_params, inp, mode=None):
    if mode is not None:
        s, ms, tks = inp["ids"], inp["mask"], inp["token_type_ids"]
        if mode == "query":
            return sentence_encode(query_params, s, ms, tks)
        return sentence_encode(key_params, s, ms, tks)

    ss = inp["query"]["ids"]
    sms = inp["query"]["mask"]
    stks = inp["query"]["token_type_ids"]
    ts = inp["key"]["ids"]
    tms = inp["key"]["mask"]
    ts = ts.reshape(-1, ts.shape[2])
    tms = tms.reshape(-1, tms.shape[2])
    # TODO(synk): original PyTorch code reuses the *query* token_type_ids for the key
    # encoder (shape-incompatible after the view / likely a bug); we use the key's own.
    ttks = inp["key"]["token_type_ids"].reshape(-1, tms.shape[1])

    query = sentence_encode(query_params, ss, sms, stks)
    key = sentence_encode(key_params, ts, tms, ttks)
    return {"key": key, "query": query}


# ----------------------------------------------------------------------------- main

if __name__ == "__main__":
    root = jax.random.PRNGKey(0)

    VOCAB, MAX_POS, TYPE_VOCAB = 50, 16, 2
    HIDDEN, N_HEADS, FFN, N_LAYERS = 32, 2, 64, 2
    B, K, S = 2, 3, 8   # batch, keys-per-query, sequence length

    query_params = init_encoder_params(
        jax.random.fold_in(root, 1), vocab=VOCAB, max_pos=MAX_POS, type_vocab=TYPE_VOCAB,
        hidden=HIDDEN, n_heads=N_HEADS, ffn=FFN, n_layers=N_LAYERS)
    key_params = init_encoder_params(      # key encoder: separate (frozen) weights
        jax.random.fold_in(root, 2), vocab=VOCAB, max_pos=MAX_POS, type_vocab=TYPE_VOCAB,
        hidden=HIDDEN, n_heads=N_HEADS, ffn=FFN, n_layers=N_LAYERS)

    k_ids, k_mask, k_keys = jax.random.split(jax.random.fold_in(root, 3), 3)

    q_ids = jax.random.randint(k_ids, (B, S), 1, VOCAB, dtype=jnp.int32)
    q_len = jnp.array([S, 5], dtype=jnp.int32)
    q_mask = (jnp.arange(S)[None, :] < q_len[:, None]).astype(jnp.int32)
    q_tks = jnp.zeros((B, S), dtype=jnp.int32)

    key_ids = jax.random.randint(k_keys, (B, K, S), 1, VOCAB, dtype=jnp.int32)
    key_len = jnp.array([[S, 6, 4], [7, S, 3]], dtype=jnp.int32)
    key_mask = (jnp.arange(S)[None, None, :] < key_len[:, :, None]).astype(jnp.int32)
    key_tks = jnp.zeros((B, K, S), dtype=jnp.int32)

    inp = {
        "query": {"ids": q_ids, "mask": q_mask, "token_type_ids": q_tks},
        "key": {"ids": key_ids, "mask": key_mask, "token_type_ids": key_tks},
    }

    out = pair_sbert_forward(query_params, key_params, inp, mode=None)
    out = jax.block_until_ready(out)

    assert out["query"].shape == (B, HIDDEN)
    assert out["key"].shape == (B * K, HIDDEN)
    # sanity: embeddings are L2 normalized
    assert bool(jnp.all(jnp.abs(jnp.linalg.norm(out["query"], axis=1) - 1.0) < 1e-2))
    assert bool(jnp.all(jnp.abs(jnp.linalg.norm(out["key"], axis=1) - 1.0) < 1e-2))
    assert bool(jnp.all(jnp.isfinite(out["query"]))) and bool(jnp.all(jnp.isfinite(out["key"])))

    # single-mode path also exercised
    single = pair_sbert_forward(query_params, key_params,
                                {"ids": q_ids, "mask": q_mask, "token_type_ids": q_tks},
                                mode="query")
    jax.block_until_ready(single)
    assert single.shape == (B, HIDDEN)

    print("KERNEL_OK")
</pallas_src>

<mosaic_0001>
module attributes {stable_mosaic.version = 11 : i64} {
  func.func @_ln_kernel(%arg0: i32, %arg1: memref<16x32xf32, #tpu.memory_space<vmem>>, %arg2: memref<1x32xf32, #tpu.memory_space<vmem>>, %arg3: memref<1x32xf32, #tpu.memory_space<vmem>>, %arg4: memref<16x32xbf16, #tpu.memory_space<vmem>>) attributes {dimension_semantics = [#tpu.dimension_semantics<parallel>], iteration_bounds = array<i64: 1>, scalar_prefetch = 0 : i64, scratch_operands = 0 : i64, tpu.core_type = #tpu.core_type<tc>, window_params = [{transform_indices = @transform_0, window_bounds = array<i64: 16, 32>}, {pipeline_mode = #tpu.pipeline_mode<synchronous>, transform_indices = @transform_1, window_bounds = array<i64: 1, 32>}, {pipeline_mode = #tpu.pipeline_mode<synchronous>, transform_indices = @transform_2, window_bounds = array<i64: 1, 32>}, {transform_indices = @transform_3, window_bounds = array<i64: 16, 32>}]} {
    %c0 = arith.constant 0 : index
    %c0_0 = arith.constant 0 : index
    %0 = vector.load %arg1[%c0, %c0_0] : memref<16x32xf32, #tpu.memory_space<vmem>>, vector<16x32xf32>
    %cst = arith.constant dense<0.000000e+00> : vector<16xf32>
    %1 = vector.multi_reduction <add>, %0, %cst [1] : vector<16x32xf32> to vector<16xf32>
    %2 = vector.shape_cast %1 : vector<16xf32> to vector<16x1xf32>
    %cst_1 = arith.constant 3.200000e+01 : f32
    %3 = vector.broadcast %cst_1 : f32 to vector<16x1xf32>
    %4 = arith.divf %2, %3 : vector<16x1xf32>
    %5 = vector.broadcast %4 : vector<16x1xf32> to vector<16x32xf32>
    %6 = arith.subf %0, %5 : vector<16x32xf32>
    %7 = arith.mulf %6, %6 : vector<16x32xf32>
    %cst_2 = arith.constant dense<0.000000e+00> : vector<16xf32>
    %8 = vector.multi_reduction <add>, %7, %cst_2 [1] : vector<16x32xf32> to vector<16xf32>
    %9 = vector.shape_cast %8 : vector<16xf32> to vector<16x1xf32>
    %cst_3 = arith.constant 3.200000e+01 : f32
    %10 = vector.broadcast %cst_3 : f32 to vector<16x1xf32>
    %11 = arith.divf %9, %10 : vector<16x1xf32>
    %cst_4 = arith.constant 9.99999996E-13 : f32
    %12 = vector.broadcast %cst_4 : f32 to vector<16x1xf32>
    %13 = arith.addf %11, %12 : vector<16x1xf32>
    %14 = math.rsqrt %13 : vector<16x1xf32>
    %15 = vector.broadcast %14 : vector<16x1xf32> to vector<16x32xf32>
    %16 = arith.mulf %6, %15 : vector<16x32xf32>
    %c0_5 = arith.constant 0 : index
    %c0_6 = arith.constant 0 : index
    %17 = vector.load %arg2[%c0_5, %c0_6] : memref<1x32xf32, #tpu.memory_space<vmem>>, vector<1x32xf32>
    %18 = vector.broadcast %17 : vector<1x32xf32> to vector<16x32xf32>
    %19 = arith.mulf %16, %18 : vector<16x32xf32>
    %c0_7 = arith.constant 0 : index
    %c0_8 = arith.constant 0 : index
    %20 = vector.load %arg3[%c0_7, %c0_8] : memref<1x32xf32, #tpu.memory_space<vmem>>, vector<1x32xf32>
    %21 = vector.broadcast %20 : vector<1x32xf32> to vector<16x32xf32>
    %22 = arith.addf %19, %21 : vector<16x32xf32>
    %23 = arith.truncf %22 : vector<16x32xf32> to vector<16x32xbf16>
    %c0_9 = arith.constant 0 : index
    %c0_10 = arith.constant 0 : index
    %24 = vector.load %arg4[%c0_9, %c0_10] : memref<16x32xbf16, #tpu.memory_space<vmem>>, vector<16x32xbf16>
    tpu.vector_store %arg4[%c0_9, %c0_10], %23 {strides = array<i32>} : memref<16x32xbf16, #tpu.memory_space<vmem>>, vector<16x32xbf16>,
    return
  }
  func.func @transform_0(%arg0: i32) -> (i32, i32) {
    %c0_i32 = arith.constant 0 : i32
    %c0_i32_0 = arith.constant 0 : i32
    return %arg0, %c0_i32 : i32, i32
  }
  func.func @transform_1(%arg0: i32) -> (i32, i32) {
    %c0_i32 = arith.constant 0 : i32
    %c0_i32_0 = arith.constant 0 : i32
    %c0_i32_1 = arith.constant 0 : i32
    return %c0_i32, %c0_i32_0 : i32, i32
  }
  func.func @transform_2(%arg0: i32) -> (i32, i32) {
    %c0_i32 = arith.constant 0 : i32
    %c0_i32_0 = arith.constant 0 : i32
    %c0_i32_1 = arith.constant 0 : i32
    return %c0_i32, %c0_i32_0 : i32, i32
  }
  func.func @transform_3(%arg0: i32) -> (i32, i32) {
    %c0_i32 = arith.constant 0 : i32
    %c0_i32_0 = arith.constant 0 : i32
    return %arg0, %c0_i32 : i32, i32
  }
}

</mosaic_0001>

<bundles_post_ra>
// kernel: tpu_custom_call.1
= control target key start
LH: loop header
LB: loop body
LE: loop exit
PB: predicated region body
PF: predicated region fallthrough
CT: control target
= control target key end

     0   :  { %8 = vsyncpa [#allocation3], 0  ;;  %s207_s0 = inlined_call_operand.hbm [shape: f32[16,32], index: 0, kind: input, shape index: {}]   ;;  %s208_s1 = inlined_call_operand.vmem [shape: f32[1,32], index: 1, kind: input, shape index: {}]   ;;  %s209_s2 = inlined_call_operand.vmem [shape: f32[1,32], index: 2, kind: input, shape index: {}]   ;;  %s210_s3 = inlined_call_operand.hbm [shape: bf16[16,32], index: 3, kind: output, shape index: {}]  }
   0x1   :  { %9 = vsyncpa [#allocation4], 0  ;;  %s165_s12 = smov [#allocation2]  }
   0x2   :  { %s15_s13 = sshll.u32 %s165_s12, 4  ;;  %s16_s13 = int_to_ptr.vmem [resolvable:$true] %s15_s13 }
   0x3   :  { %s129_s14 = scalar_lea.vmem %s16_s13, 256  ;;  %p134_p1 = scmp.lt.s32.totalorder %s16_s13, %s16_s13 }
   0x4   :  { %p130_p0 = scmp.ne.s32.totalorder %s16_s13, %s129_s14  ;;  %p135_p2 = scmp.lt.s32.totalorder %s129_s14, %s129_s14 }
   0x6   :  { %p136_p3 = por %p135_p2, %p134_p1 }
   0x8   :  { %p137_p4 = pnand %p136_p3, %p130_p0 }
   0xa   :  { %140 = shalt.err (!%p137_p4)
}
   0xb   :  { %s166_s15 = smov 128   ;;  %s167_s16 = smov 8  }
   0xc   :  { %21 = dma.hbm_to_vmem [thread:$0]  %s207_s0, 256, %s16_s13, [#allocation3], %s166_s15, %s166_s15, %s167_s16  }
   0xd   :  { %161 = dma.done.wait [#allocation3], 256  }
   0xe   :  { %162 = vsyncadd [#allocation3], 4294967040  ;;  %vm31_vm0 = vcmask 261120   ;;  %v29_v0 = vld [vmem:[#allocation2] sm:$0xff]  ;;  %v30_v1 = vld [vmem:[#allocation2 + $0x8] sm:$0xff]  ;;  %vm85_vm1 = vcmask 257024  }
   0xf   :  { %v32_v2 = vsel %vm31_vm0, %v29_v0, 0.0  ;;  %v35_v3 = vsel %vm31_vm0, %v30_v1, 0.0  ;;  %v105_v21 = vld [vmem:[%s208_s1] ss:$0 sm:$0xff]  ;;  %s168_s22 = smov [#allocation5]  }
  0x10   :  { %33 = vadd.xlane.f32.xlu0 %v32_v2  ;;  %v106_v23 = vld [vmem:[%s209_s2] ss:$0 sm:$0xff]  ;;  %s93_s23 = sshll.u32 %s168_s22, 4  ;;  %s94_s23 = int_to_ptr.vmem [resolvable:$true] %s93_s23 }
  0x11   :  { %s141_s1 = scalar_lea.vmem %s94_s23, 128  ;;  %p146_p6 = scmp.lt.s32.totalorder %s94_s23, %s94_s23 }
  0x12   :  { %p142_p5 = scmp.ne.s32.totalorder %s94_s23, %s141_s1  ;;  %p147_p7 = scmp.lt.s32.totalorder %s141_s1, %s141_s1 }
  0x14   :  { %36 = vadd.xlane.f32.xlu0 %v35_v3  ;;  %p148_p8 = por %p147_p7, %p146_p6 }
  0x16   :  { %p149_p9 = pnand %p148_p8, %p142_p5 }
  0x99   :  { %v34_v4 = vpop.xlane.xlu0 %33 }
  0x9a   :  { %v39_v5 = vmul.f32 0.03125, %v34_v4 }
  0x9c   :  { %v41_v6 = vsub.f32 %v29_v0, %v39_v5 }
  0x9d   :  { %v37_v7 = vpop.xlane.xlu0 %36 }
  0x9e   :  { %v40_v8 = vmul.f32 0.03125, %v37_v7  ;;  %v43_v9 = vmul.f32 %v41_v6, %v41_v6 }
  0xa0   :  { %v42_v10 = vsub.f32 %v30_v1, %v40_v8  ;;  %v45_v11 = vsel %vm31_vm0, %v43_v9, 0.0 }
  0xa1   :  { %46 = vadd.xlane.f32.xlu1 %v45_v11 }
  0xa2   :  { %v44_v12 = vmul.f32 %v42_v10, %v42_v10 }
  0xa4   :  { %v48_v13 = vsel %vm31_vm0, %v44_v12, 0.0 }
  0xa5   :  { %49 = vadd.xlane.f32.xlu1 %v48_v13 }
 0x12a   :  { %v47_v14 = vpop.xlane.xlu1 %46 }
 0x12b   :  { %v51_v15 = vmul.f32 0.03125, %v47_v14 }
 0x12d   :  { %v53_v16 = vadd.f32 1e-12, %v51_v15 }
 0x12e   :  { %v50_v17 = vpop.xlane.xlu1 %49 }
 0x12f   :  { %117 = vrsqrt.f32 %v53_v16  ;;  %v52_v18 = vmul.f32 0.03125, %v50_v17 }
 0x131   :  { %v54_v19 = vadd.f32 1e-12, %v52_v18 }
 0x133   :  { %119 = vrsqrt.f32 %v54_v19 }
 0x13c   :  { %v118_v20 = vpop.eup %117 }
 0x13d   :  { %v57_v22 = vmul.f32 %v118_v20, %v41_v6 }
 0x13f   :  { %v66_v24 = vmul.f32 %v105_v21, %v57_v22 }
 0x140   :  { %v120_v25 = vpop.eup %119 }
 0x141   :  { %v58_v26 = vmul.f32 %v120_v25, %v42_v10  ;;  %v75_v27 = vadd.f32 %v106_v23, %v66_v24 }
 0x143   :  { %v67_v28 = vmul.f32 %v105_v21, %v58_v26  ;;  %v109_v29 = vpack.c.bf16 %v75_v27, %v75_v27 }
 0x145   :  { %v76_v30 = vadd.f32 %v106_v23, %v67_v28  ;;  %86 = vst.msk [vmem:[#allocation5] sm:$0xf] %vm85_vm1, %v109_v29 }
 0x147   :  { %v110_v31 = vpack.c.bf16 %v76_v30, %v76_v30 }
 0x149   :  { %87 = vst.msk [vmem:[#allocation5 + $0x4] sm:$0xf] %vm85_vm1, %v110_v31 }
 0x14a   :  { %152 = shalt.err (!%p149_p9)
}
 0x14b   :  { %s169_s2 = smov 64   ;;  %s170_s24 = smov 4  }
 0x14c   :  { %99 = dma.vmem_to_hbm [thread:$0]  %s94_s23, 128, %s210_s3, [#allocation4], %s169_s2, %s169_s2, %s170_s24  }
 0x14d   :  { %163 = dma.done.wait [#allocation4], 128  }
 0x14e   :  { %164 = vsyncadd [#allocation4], 4294967168 }
 0x14f   :  { %103 = vsyncpa [#allocation3], 1 }
 0x150   :  { %104 = vsyncpa [#allocation4], 1 }

</bundles_post_ra>
